<compile_context>
chip_gen: v5e
topology: v5e:2x2
jax: 0.10.0
libtpu: 0.0.40
codegen_flags: <defaults>
</compile_context>

<pallas_src>
import math

import jax
import jax.numpy as jnp
from jax import lax
from jax.experimental import pallas as pl
from jax.experimental.pallas import tpu as pltpu


def _mhsa_kernel(num_heads, d_k):
    inv_scale = 1.0 / math.sqrt(d_k)   # python float -> literal, not a captured const

    def kernel(xq_ref, xk_ref, xv_ref,
               wq_ref, wk_ref, wv_ref,
               bq_ref, bk_ref, bv_ref,
               ctx_ref, attn_ref):
        Bt, Sq, D = xq_ref.shape
        Sk = xk_ref.shape[1]

        # Full-width projections for the whole batch block: M = Bt*S rows pack
        # the MXU; N = D (all heads at once).
        xq = xq_ref[...].reshape(Bt * Sq, D)
        xk = xk_ref[...].reshape(Bt * Sk, D)
        xv = xv_ref[...].reshape(Bt * Sk, D)

        q = (jnp.dot(xq, wq_ref[...], preferred_element_type=jnp.float32)
             + bq_ref[...]).reshape(Bt, Sq, D)
        k = (jnp.dot(xk, wk_ref[...], preferred_element_type=jnp.float32)
             + bk_ref[...]).reshape(Bt, Sk, D)
        v = (jnp.dot(xv, wv_ref[...], preferred_element_type=jnp.float32)
             + bv_ref[...]).reshape(Bt, Sk, D)

        # Scaled_Dot_Product_Attention semantics: exp (no max-subtraction), +1e-8 eps.
        # TODO(synk): the `length` / attn_mask path of the PyTorch module is not implemented.
        for b in range(Bt):
            ctx_parts = []
            for h in range(num_heads):
                lo = h * d_k
                qh = q[b, :, lo:lo + d_k]          # (Sq, d_k)
                kh = k[b, :, lo:lo + d_k]          # (Sk, d_k)
                vh = v[b, :, lo:lo + d_k]          # (Sk, d_k)
                # Contract last dims directly (no explicit k.T / XLU transpose).
                s = lax.dot_general(
                    qh, kh, (((1,), (1,)), ((), ())),
                    preferred_element_type=jnp.float32) * inv_scale
                s = jnp.exp(s)
                attn = s / (jnp.sum(s, axis=-1, keepdims=True) + 1e-8)
                ctx_parts.append(
                    jnp.dot(attn, vh, preferred_element_type=jnp.float32))
                attn_ref[b, h, :, :] = attn.astype(attn_ref.dtype)
            # Heads packed along lanes -> one lane-dense (Sq, D) store in the
            # final output layout (no wrapper transpose needed).
            ctx_ref[b, :, :] = jnp.concatenate(ctx_parts, axis=-1).astype(ctx_ref.dtype)

    return kernel


def multi_head_self_attention(Q, params, num_heads, K=None, V=None, batch_block=None):
    """JAX/Pallas equivalent of Multi_Head_Self_Attention.forward (length=None).

    Q, K, V: (B, S, d_model) float32.
    Returns (context (B, Sq, d_model), attn (B, H, Sq, Sk)).
    """
    if K is None:
        K = Q
    if V is None:
        V = Q

    B, Sq, D = Q.shape
    Sk = K.shape[1]
    H = num_heads
    assert D % H == 0
    d_k = D // H

    if batch_block is None:
        batch_block = B          # NRMS batches/sequences are small: pack them all
    assert B % batch_block == 0
    Bt = batch_block

    # PyTorch Linear: y = x @ W.T + b  -> pass W.T and a (1, D) bias.
    WqT, WkT, WvT = params["Wq"].T, params["Wk"].T, params["Wv"].T
    bq = params["bq"].reshape(1, D)
    bk = params["bk"].reshape(1, D)
    bv = params["bv"].reshape(1, D)

    act_q = pl.BlockSpec((Bt, Sq, D), lambda i: (i, 0, 0))
    act_k = pl.BlockSpec((Bt, Sk, D), lambda i: (i, 0, 0))
    w_spec = pl.BlockSpec((D, D), lambda i: (0, 0))      # constant block: DMA'd once
    b_spec = pl.BlockSpec((1, D), lambda i: (0, 0))

    context, attn = pl.pallas_call(
        _mhsa_kernel(H, d_k),
        out_shape=(
            jax.ShapeDtypeStruct((B, Sq, D), jnp.float32),
            jax.ShapeDtypeStruct((B, H, Sq, Sk), jnp.float32),
        ),
        grid_spec=pltpu.PrefetchScalarGridSpec(
            num_scalar_prefetch=0,
            grid=(B // Bt,),
            in_specs=[
                act_q, act_k, act_k,      # xq, xk, xv
                w_spec, w_spec, w_spec,   # Wq.T, Wk.T, Wv.T
                b_spec, b_spec, b_spec,   # bq, bk, bv
            ],
            out_specs=[
                pl.BlockSpec((Bt, Sq, D), lambda i: (i, 0, 0)),
                pl.BlockSpec((Bt, H, Sq, Sk), lambda i: (i, 0, 0, 0)),
            ],
        ),
        compiler_params=pltpu.CompilerParams(
            dimension_semantics=("parallel",)),
    )(Q, K, V, WqT, WkT, WvT, bq, bk, bv)

    return context, attn


def init_params(key, d_model):
    """Deterministic parameter init mirroring the module's shapes.

    Weights: xavier_uniform (gain=1).  Biases: uniform(-1/sqrt(fan_in), 1/sqrt(fan_in))
    (PyTorch nn.Linear default, untouched by _initialize_weights)."""
    keys = jax.random.split(key, 6)
    limit_w = math.sqrt(6.0 / (d_model + d_model))
    limit_b = 1.0 / math.sqrt(d_model)

    def w(k):
        return jax.random.uniform(k, (d_model, d_model), jnp.float32, -limit_w, limit_w)

    def b(k):
        return jax.random.uniform(k, (d_model,), jnp.float32, -limit_b, limit_b)

    return {
        "Wq": w(keys[0]), "bq": b(keys[1]),
        "Wk": w(keys[2]), "bk": b(keys[3]),
        "Wv": w(keys[4]), "bv": b(keys[5]),
    }


def _reference(Q, params, num_heads):
    """Pure-JAX reference replicating the PyTorch forward (length=None, K=V=Q)."""
    B, S, D = Q.shape
    H = num_heads
    d_k = D // H

    def proj(W, b):
        y = Q @ W.T + b                                              # (B, S, D)
        return jnp.transpose(y.reshape(B, S, H, d_k), (0, 2, 1, 3))  # (B, H, S, d_k)

    q_s = proj(params["Wq"], params["bq"])
    k_s = proj(params["Wk"], params["bk"])
    v_s = proj(params["Wv"], params["bv"])

    scores = jnp.einsum("bhqd,bhkd->bhqk", q_s, k_s) / math.sqrt(d_k)
    scores = jnp.exp(scores)
    attn = scores / (jnp.sum(scores, axis=-1, keepdims=True) + 1e-8)
    context = jnp.einsum("bhqk,bhkd->bhqd", attn, v_s)
    context = jnp.transpose(context, (0, 2, 1, 3)).reshape(B, S, D)
    return context, attn


if __name__ == "__main__":
    batch, seq, d_model, num_heads = 2, 8, 32, 4

    key = jax.random.PRNGKey(0)
    k_x, k_p = jax.random.split(key)
    Q = jax.random.normal(k_x, (batch, seq, d_model), dtype=jnp.float32)
    params = init_params(k_p, d_model)

    context, attn = multi_head_self_attention(Q, params, num_heads)
    context = jax.block_until_ready(context)
    attn = jax.block_until_ready(attn)

    ctx_ref, attn_ref = _reference(Q, params, num_heads)
    assert context.shape == (batch, seq, d_model)
    assert attn.shape == (batch, num_heads, seq, seq)
    assert jnp.allclose(context, ctx_ref, atol=1e-5, rtol=1e-5)
    assert jnp.allclose(attn, attn_ref, atol=1e-5, rtol=1e-5)

    print("KERNEL_OK")
</pallas_src>

<mosaic_0001>
module attributes {stable_mosaic.version = 11 : i64} {
  func.func @kernel(%arg0: i32, %arg1: memref<2x8x32xf32, #tpu.memory_space<vmem>>, %arg2: memref<2x8x32xf32, #tpu.memory_space<vmem>>, %arg3: memref<2x8x32xf32, #tpu.memory_space<vmem>>, %arg4: memref<32x32xf32, #tpu.memory_space<vmem>>, %arg5: memref<32x32xf32, #tpu.memory_space<vmem>>, %arg6: memref<32x32xf32, #tpu.memory_space<vmem>>, %arg7: memref<1x32xf32, #tpu.memory_space<vmem>>, %arg8: memref<1x32xf32, #tpu.memory_space<vmem>>, %arg9: memref<1x32xf32, #tpu.memory_space<vmem>>, %arg10: memref<2x8x32xf32, #tpu.memory_space<vmem>>, %arg11: memref<2x4x8x8xf32, #tpu.memory_space<vmem>>) attributes {dimension_semantics = [#tpu.dimension_semantics<parallel>], iteration_bounds = array<i64: 1>, scalar_prefetch = 0 : i64, scratch_operands = 0 : i64, tpu.core_type = #tpu.core_type<tc>, window_params = [{transform_indices = @transform_0, window_bounds = array<i64: 2, 8, 32>}, {transform_indices = @transform_1, window_bounds = array<i64: 2, 8, 32>}, {transform_indices = @transform_2, window_bounds = array<i64: 2, 8, 32>}, {pipeline_mode = #tpu.pipeline_mode<synchronous>, transform_indices = @transform_3, window_bounds = array<i64: 32, 32>}, {pipeline_mode = #tpu.pipeline_mode<synchronous>, transform_indices = @transform_4, window_bounds = array<i64: 32, 32>}, {pipeline_mode = #tpu.pipeline_mode<synchronous>, transform_indices = @transform_5, window_bounds = array<i64: 32, 32>}, {pipeline_mode = #tpu.pipeline_mode<synchronous>, transform_indices = @transform_6, window_bounds = array<i64: 1, 32>}, {pipeline_mode = #tpu.pipeline_mode<synchronous>, transform_indices = @transform_7, window_bounds = array<i64: 1, 32>}, {pipeline_mode = #tpu.pipeline_mode<synchronous>, transform_indices = @transform_8, window_bounds = array<i64: 1, 32>}, {transform_indices = @transform_9, window_bounds = array<i64: 2, 8, 32>}, {transform_indices = @transform_10, window_bounds = array<i64: 2, 4, 8, 8>}]} {
    %c0 = arith.constant 0 : index
    %c0_0 = arith.constant 0 : index
    %c0_1 = arith.constant 0 : index
    %0 = vector.load %arg1[%c0, %c0_0, %c0_1] : memref<2x8x32xf32, #tpu.memory_space<vmem>>, vector<2x8x32xf32>
    %1 = vector.shape_cast %0 : vector<2x8x32xf32> to vector<16x32xf32>
    %c0_2 = arith.constant 0 : index
    %c0_3 = arith.constant 0 : index
    %c0_4 = arith.constant 0 : index
    %2 = vector.load %arg2[%c0_2, %c0_3, %c0_4] : memref<2x8x32xf32, #tpu.memory_space<vmem>>, vector<2x8x32xf32>
    %3 = vector.shape_cast %2 : vector<2x8x32xf32> to vector<16x32xf32>
    %c0_5 = arith.constant 0 : index
    %c0_6 = arith.constant 0 : index
    %c0_7 = arith.constant 0 : index
    %4 = vector.load %arg3[%c0_5, %c0_6, %c0_7] : memref<2x8x32xf32, #tpu.memory_space<vmem>>, vector<2x8x32xf32>
    %5 = vector.shape_cast %4 : vector<2x8x32xf32> to vector<16x32xf32>
    %c0_8 = arith.constant 0 : index
    %c0_9 = arith.constant 0 : index
    %6 = vector.load %arg4[%c0_8, %c0_9] : memref<32x32xf32, #tpu.memory_space<vmem>>, vector<32x32xf32>
    %cst = arith.constant dense<0.000000e+00> : vector<16x32xf32>
    %7 = tpu.matmul %1, %6, %cst {dimension_numbers = #tpu.dot_dimension_numbers<[1], [0], [0], [1], [0, 0, 1, 1], [], []>} : vector<16x32xf32>, vector<32x32xf32>, vector<16x32xf32> -> vector<16x32xf32>
    %c0_10 = arith.constant 0 : index
    %c0_11 = arith.constant 0 : index
    %8 = vector.load %arg7[%c0_10, %c0_11] : memref<1x32xf32, #tpu.memory_space<vmem>>, vector<1x32xf32>
    %9 = vector.broadcast %8 : vector<1x32xf32> to vector<16x32xf32>
    %10 = arith.addf %7, %9 : vector<16x32xf32>
    %11 = vector.shape_cast %10 : vector<16x32xf32> to vector<2x8x32xf32>
    %c0_12 = arith.constant 0 : index
    %c0_13 = arith.constant 0 : index
    %12 = vector.load %arg5[%c0_12, %c0_13] : memref<32x32xf32, #tpu.memory_space<vmem>>, vector<32x32xf32>
    %cst_14 = arith.constant dense<0.000000e+00> : vector<16x32xf32>
    %13 = tpu.matmul %3, %12, %cst_14 {dimension_numbers = #tpu.dot_dimension_numbers<[1], [0], [0], [1], [0, 0, 1, 1], [], []>} : vector<16x32xf32>, vector<32x32xf32>, vector<16x32xf32> -> vector<16x32xf32>
    %c0_15 = arith.constant 0 : index
    %c0_16 = arith.constant 0 : index
    %14 = vector.load %arg8[%c0_15, %c0_16] : memref<1x32xf32, #tpu.memory_space<vmem>>, vector<1x32xf32>
    %15 = vector.broadcast %14 : vector<1x32xf32> to vector<16x32xf32>
    %16 = arith.addf %13, %15 : vector<16x32xf32>
    %17 = vector.shape_cast %16 : vector<16x32xf32> to vector<2x8x32xf32>
    %c0_17 = arith.constant 0 : index
    %c0_18 = arith.constant 0 : index
    %18 = vector.load %arg6[%c0_17, %c0_18] : memref<32x32xf32, #tpu.memory_space<vmem>>, vector<32x32xf32>
    %cst_19 = arith.constant dense<0.000000e+00> : vector<16x32xf32>
    %19 = tpu.matmul %5, %18, %cst_19 {dimension_numbers = #tpu.dot_dimension_numbers<[1], [0], [0], [1], [0, 0, 1, 1], [], []>} : vector<16x32xf32>, vector<32x32xf32>, vector<16x32xf32> -> vector<16x32xf32>
    %c0_20 = arith.constant 0 : index
    %c0_21 = arith.constant 0 : index
    %20 = vector.load %arg9[%c0_20, %c0_21] : memref<1x32xf32, #tpu.memory_space<vmem>>, vector<1x32xf32>
    %21 = vector.broadcast %20 : vector<1x32xf32> to vector<16x32xf32>
    %22 = arith.addf %19, %21 : vector<16x32xf32>
    %23 = vector.shape_cast %22 : vector<16x32xf32> to vector<2x8x32xf32>
    %24 = vector.extract_strided_slice %11 {offsets = [0, 0, 0], sizes = [1, 8, 8], strides = [1, 1, 1]} : vector<2x8x32xf32> to vector<1x8x8xf32>
    %25 = vector.shape_cast %24 : vector<1x8x8xf32> to vector<8x8xf32>
    %26 = vector.extract_strided_slice %17 {offsets = [0, 0, 0], sizes = [1, 8, 8], strides = [1, 1, 1]} : vector<2x8x32xf32> to vector<1x8x8xf32>
    %27 = vector.shape_cast %26 : vector<1x8x8xf32> to vector<8x8xf32>
    %28 = vector.extract_strided_slice %23 {offsets = [0, 0, 0], sizes = [1, 8, 8], strides = [1, 1, 1]} : vector<2x8x32xf32> to vector<1x8x8xf32>
    %29 = vector.shape_cast %28 : vector<1x8x8xf32> to vector<8x8xf32>
    %cst_22 = arith.constant dense<0.000000e+00> : vector<8x8xf32>
    %30 = tpu.matmul %25, %27, %cst_22 {dimension_numbers = #tpu.dot_dimension_numbers<[1], [1], [0], [0], [0, 0, 1, 0], [], []>} : vector<8x8xf32>, vector<8x8xf32>, vector<8x8xf32> -> vector<8x8xf32>
    %cst_23 = arith.constant 0.353553385 : f32
    %31 = vector.broadcast %cst_23 : f32 to vector<8x8xf32>
    %32 = arith.mulf %30, %31 : vector<8x8xf32>
    %33 = math.exp %32 : vector<8x8xf32>
    %cst_24 = arith.constant dense<0.000000e+00> : vector<8xf32>
    %34 = vector.multi_reduction <add>, %33, %cst_24 [1] : vector<8x8xf32> to vector<8xf32>
    %35 = vector.shape_cast %34 : vector<8xf32> to vector<8x1xf32>
    %cst_25 = arith.constant 9.99999993E-9 : f32
    %36 = vector.broadcast %cst_25 : f32 to vector<8x1xf32>
    %37 = arith.addf %35, %36 : vector<8x1xf32>
    %38 = vector.broadcast %37 : vector<8x1xf32> to vector<8x8xf32>
    %39 = arith.divf %33, %38 : vector<8x8xf32>
    %cst_26 = arith.constant dense<0.000000e+00> : vector<8x8xf32>
    %40 = tpu.matmul %39, %29, %cst_26 {dimension_numbers = #tpu.dot_dimension_numbers<[1], [0], [0], [1], [0, 0, 1, 1], [], []>} : vector<8x8xf32>, vector<8x8xf32>, vector<8x8xf32> -> vector<8x8xf32>
    %c0_27 = arith.constant 0 : index
    %c0_28 = arith.constant 0 : index
    %c0_29 = arith.constant 0 : index
    %c0_30 = arith.constant 0 : index
    %41 = vector.load %arg11[%c0_27, %c0_28, %c0_29, %c0_30] : memref<2x4x8x8xf32, #tpu.memory_space<vmem>>, vector<1x1x8x8xf32>
    %42 = vector.shape_cast %41 : vector<1x1x8x8xf32> to vector<8x8xf32>
    %43 = vector.shape_cast %39 : vector<8x8xf32> to vector<1x1x8x8xf32>
    tpu.vector_store %arg11[%c0_27, %c0_28, %c0_29, %c0_30], %43 {strides = array<i32>} : memref<2x4x8x8xf32, #tpu.memory_space<vmem>>, vector<1x1x8x8xf32>,
    %44 = vector.extract_strided_slice %11 {offsets = [0, 0, 8], sizes = [1, 8, 8], strides = [1, 1, 1]} : vector<2x8x32xf32> to vector<1x8x8xf32>
    %45 = vector.shape_cast %44 : vector<1x8x8xf32> to vector<8x8xf32>
    %46 = vector.extract_strided_slice %17 {offsets = [0, 0, 8], sizes = [1, 8, 8], strides = [1, 1, 1]} : vector<2x8x32xf32> to vector<1x8x8xf32>
    %47 = vector.shape_cast %46 : vector<1x8x8xf32> to vector<8x8xf32>
    %48 = vector.extract_strided_slice %23 {offsets = [0, 0, 8], sizes = [1, 8, 8], strides = [1, 1, 1]} : vector<2x8x32xf32> to vector<1x8x8xf32>
    %49 = vector.shape_cast %48 : vector<1x8x8xf32> to vector<8x8xf32>
    %cst_31 = arith.constant dense<0.000000e+00> : vector<8x8xf32>
    %50 = tpu.matmul %45, %47, %cst_31 {dimension_numbers = #tpu.dot_dimension_numbers<[1], [1], [0], [0], [0, 0, 1, 0], [], []>} : vector<8x8xf32>, vector<8x8xf32>, vector<8x8xf32> -> vector<8x8xf32>
    %cst_32 = arith.constant 0.353553385 : f32
    %51 = vector.broadcast %cst_32 : f32 to vector<8x8xf32>
    %52 = arith.mulf %50, %51 : vector<8x8xf32>
    %53 = math.exp %52 : vector<8x8xf32>
    %cst_33 = arith.constant dense<0.000000e+00> : vector<8xf32>
    %54 = vector.multi_reduction <add>, %53, %cst_33 [1] : vector<8x8xf32> to vector<8xf32>
    %55 = vector.shape_cast %54 : vector<8xf32> to vector<8x1xf32>
    %cst_34 = arith.constant 9.99999993E-9 : f32
    %56 = vector.broadcast %cst_34 : f32 to vector<8x1xf32>
    %57 = arith.addf %55, %56 : vector<8x1xf32>
    %58 = vector.broadcast %57 : vector<8x1xf32> to vector<8x8xf32>
    %59 = arith.divf %53, %58 : vector<8x8xf32>
    %cst_35 = arith.constant dense<0.000000e+00> : vector<8x8xf32>
    %60 = tpu.matmul %59, %49, %cst_35 {dimension_numbers = #tpu.dot_dimension_numbers<[1], [0], [0], [1], [0, 0, 1, 1], [], []>} : vector<8x8xf32>, vector<8x8xf32>, vector<8x8xf32> -> vector<8x8xf32>
    %c0_36 = arith.constant 0 : index
    %c1 = arith.constant 1 : index
    %c0_37 = arith.constant 0 : index
    %c0_38 = arith.constant 0 : index
    %61 = vector.load %arg11[%c0_36, %c1, %c0_37, %c0_38] : memref<2x4x8x8xf32, #tpu.memory_space<vmem>>, vector<1x1x8x8xf32>
    %62 = vector.shape_cast %61 : vector<1x1x8x8xf32> to vector<8x8xf32>
    %63 = vector.shape_cast %59 : vector<8x8xf32> to vector<1x1x8x8xf32>
    tpu.vector_store %arg11[%c0_36, %c1, %c0_37, %c0_38], %63 {strides = array<i32>} : memref<2x4x8x8xf32, #tpu.memory_space<vmem>>, vector<1x1x8x8xf32>,
    %64 = vector.extract_strided_slice %11 {offsets = [0, 0, 16], sizes = [1, 8, 8], strides = [1, 1, 1]} : vector<2x8x32xf32> to vector<1x8x8xf32>
    %65 = vector.shape_cast %64 : vector<1x8x8xf32> to vector<8x8xf32>
    %66 = vector.extract_strided_slice %17 {offsets = [0, 0, 16], sizes = [1, 8, 8], strides = [1, 1, 1]} : vector<2x8x32xf32> to vector<1x8x8xf32>
    %67 = vector.shape_cast %66 : vector<1x8x8xf32> to vector<8x8xf32>
    %68 = vector.extract_strided_slice %23 {offsets = [0, 0, 16], sizes = [1, 8, 8], strides = [1, 1, 1]} : vector<2x8x32xf32> to vector<1x8x8xf32>
    %69 = vector.shape_cast %68 : vector<1x8x8xf32> to vector<8x8xf32>
    %cst_39 = arith.constant dense<0.000000e+00> : vector<8x8xf32>
    %70 = tpu.matmul %65, %67, %cst_39 {dimension_numbers = #tpu.dot_dimension_numbers<[1], [1], [0], [0], [0, 0, 1, 0], [], []>} : vector<8x8xf32>, vector<8x8xf32>, vector<8x8xf32> -> vector<8x8xf32>
    %cst_40 = arith.constant 0.353553385 : f32
    %71 = vector.broadcast %cst_40 : f32 to vector<8x8xf32>
    %72 = arith.mulf %70, %71 : vector<8x8xf32>
    %73 = math.exp %72 : vector<8x8xf32>
    %cst_41 = arith.constant dense<0.000000e+00> : vector<8xf32>
    %74 = vector.multi_reduction <add>, %73, %cst_41 [1] : vector<8x8xf32> to vector<8xf32>
    %75 = vector.shape_cast %74 : vector<8xf32> to vector<8x1xf32>
    %cst_42 = arith.constant 9.99999993E-9 : f32
    %76 = vector.broadcast %cst_42 : f32 to vector<8x1xf32>
    %77 = arith.addf %75, %76 : vector<8x1xf32>
    %78 = vector.broadcast %77 : vector<8x1xf32> to vector<8x8xf32>
    %79 = arith.divf %73, %78 : vector<8x8xf32>
    %cst_43 = arith.constant dense<0.000000e+00> : vector<8x8xf32>
    %80 = tpu.matmul %79, %69, %cst_43 {dimension_numbers = #tpu.dot_dimension_numbers<[1], [0], [0], [1], [0, 0, 1, 1], [], []>} : vector<8x8xf32>, vector<8x8xf32>, vector<8x8xf32> -> vector<8x8xf32>
    %c0_44 = arith.constant 0 : index
    %c2 = arith.constant 2 : index
    %c0_45 = arith.constant 0 : index
    %c0_46 = arith.constant 0 : index
    %81 = vector.load %arg11[%c0_44, %c2, %c0_45, %c0_46] : memref<2x4x8x8xf32, #tpu.memory_space<vmem>>, vector<1x1x8x8xf32>
    %82 = vector.shape_cast %81 : vector<1x1x8x8xf32> to vector<8x8xf32>
    %83 = vector.shape_cast %79 : vector<8x8xf32> to vector<1x1x8x8xf32>
    tpu.vector_store %arg11[%c0_44, %c2, %c0_45, %c0_46], %83 {strides = array<i32>} : memref<2x4x8x8xf32, #tpu.memory_space<vmem>>, vector<1x1x8x8xf32>,
    %84 = vector.extract_strided_slice %11 {offsets = [0, 0, 24], sizes = [1, 8, 8], strides = [1, 1, 1]} : vector<2x8x32xf32> to vector<1x8x8xf32>
    %85 = vector.shape_cast %84 : vector<1x8x8xf32> to vector<8x8xf32>
    %86 = vector.extract_strided_slice %17 {offsets = [0, 0, 24], sizes = [1, 8, 8], strides = [1, 1, 1]} : vector<2x8x32xf32> to vector<1x8x8xf32>
    %87 = vector.shape_cast %86 : vector<1x8x8xf32> to vector<8x8xf32>
    %88 = vector.extract_strided_slice %23 {offsets = [0, 0, 24], sizes = [1, 8, 8], strides = [1, 1, 1]} : vector<2x8x32xf32> to vector<1x8x8xf32>
    %89 = vector.shape_cast %88 : vector<1x8x8xf32> to vector<8x8xf32>
    %cst_47 = arith.constant dense<0.000000e+00> : vector<8x8xf32>
    %90 = tpu.matmul %85, %87, %cst_47 {dimension_numbers = #tpu.dot_dimension_numbers<[1], [1], [0], [0], [0, 0, 1, 0], [], []>} : vector<8x8xf32>, vector<8x8xf32>, vector<8x8xf32> -> vector<8x8xf32>
    %cst_48 = arith.constant 0.353553385 : f32
    %91 = vector.broadcast %cst_48 : f32 to vector<8x8xf32>
    %92 = arith.mulf %90, %91 : vector<8x8xf32>
    %93 = math.exp %92 : vector<8x8xf32>
    %cst_49 = arith.constant dense<0.000000e+00> : vector<8xf32>
    %94 = vector.multi_reduction <add>, %93, %cst_49 [1] : vector<8x8xf32> to vector<8xf32>
    %95 = vector.shape_cast %94 : vector<8xf32> to vector<8x1xf32>
    %cst_50 = arith.constant 9.99999993E-9 : f32
    %96 = vector.broadcast %cst_50 : f32 to vector<8x1xf32>
    %97 = arith.addf %95, %96 : vector<8x1xf32>
    %98 = vector.broadcast %97 : vector<8x1xf32> to vector<8x8xf32>
    %99 = arith.divf %93, %98 : vector<8x8xf32>
    %cst_51 = arith.constant dense<0.000000e+00> : vector<8x8xf32>
    %100 = tpu.matmul %99, %89, %cst_51 {dimension_numbers = #tpu.dot_dimension_numbers<[1], [0], [0], [1], [0, 0, 1, 1], [], []>} : vector<8x8xf32>, vector<8x8xf32>, vector<8x8xf32> -> vector<8x8xf32>
    %c0_52 = arith.constant 0 : index
    %c3 = arith.constant 3 : index
    %c0_53 = arith.constant 0 : index
    %c0_54 = arith.constant 0 : index
    %101 = vector.load %arg11[%c0_52, %c3, %c0_53, %c0_54] : memref<2x4x8x8xf32, #tpu.memory_space<vmem>>, vector<1x1x8x8xf32>
    %102 = vector.shape_cast %101 : vector<1x1x8x8xf32> to vector<8x8xf32>
    %103 = vector.shape_cast %99 : vector<8x8xf32> to vector<1x1x8x8xf32>
    tpu.vector_store %arg11[%c0_52, %c3, %c0_53, %c0_54], %103 {strides = array<i32>} : memref<2x4x8x8xf32, #tpu.memory_space<vmem>>, vector<1x1x8x8xf32>,
    %104 = tpu.concatenate %40, %60, %80, %100 in 1 : vector<8x8xf32>, vector<8x8xf32>, vector<8x8xf32>, vector<8x8xf32> -> vector<8x32xf32>
    %c0_55 = arith.constant 0 : index
    %c0_56 = arith.constant 0 : index
    %c0_57 = arith.constant 0 : index
    %105 = vector.load %arg10[%c0_55, %c0_56, %c0_57] : memref<2x8x32xf32, #tpu.memory_space<vmem>>, vector<1x8x32xf32>
    %106 = vector.shape_cast %105 : vector<1x8x32xf32> to vector<8x32xf32>
    %107 = vector.shape_cast %104 : vector<8x32xf32> to vector<1x8x32xf32>
    tpu.vector_store %arg10[%c0_55, %c0_56, %c0_57], %107 {strides = array<i32>} : memref<2x8x32xf32, #tpu.memory_space<vmem>>, vector<1x8x32xf32>,
    %108 = vector.extract_strided_slice %11 {offsets = [1, 0, 0], sizes = [1, 8, 8], strides = [1, 1, 1]} : vector<2x8x32xf32> to vector<1x8x8xf32>
    %109 = vector.shape_cast %108 : vector<1x8x8xf32> to vector<8x8xf32>
    %110 = vector.extract_strided_slice %17 {offsets = [1, 0, 0], sizes = [1, 8, 8], strides = [1, 1, 1]} : vector<2x8x32xf32> to vector<1x8x8xf32>
    %111 = vector.shape_cast %110 : vector<1x8x8xf32> to vector<8x8xf32>
    %112 = vector.extract_strided_slice %23 {offsets = [1, 0, 0], sizes = [1, 8, 8], strides = [1, 1, 1]} : vector<2x8x32xf32> to vector<1x8x8xf32>
    %113 = vector.shape_cast %112 : vector<1x8x8xf32> to vector<8x8xf32>
    %cst_58 = arith.constant dense<0.000000e+00> : vector<8x8xf32>
    %114 = tpu.matmul %109, %111, %cst_58 {dimension_numbers = #tpu.dot_dimension_numbers<[1], [1], [0], [0], [0, 0, 1, 0], [], []>} : vector<8x8xf32>, vector<8x8xf32>, vector<8x8xf32> -> vector<8x8xf32>
    %cst_59 = arith.constant 0.353553385 : f32
    %115 = vector.broadcast %cst_59 : f32 to vector<8x8xf32>
    %116 = arith.mulf %114, %115 : vector<8x8xf32>
    %117 = math.exp %116 : vector<8x8xf32>
    %cst_60 = arith.constant dense<0.000000e+00> : vector<8xf32>
    %118 = vector.multi_reduction <add>, %117, %cst_60 [1] : vector<8x8xf32> to vector<8xf32>
    %119 = vector.shape_cast %118 : vector<8xf32> to vector<8x1xf32>
    %cst_61 = arith.constant 9.99999993E-9 : f32
    %120 = vector.broadcast %cst_61 : f32 to vector<8x1xf32>
    %121 = arith.addf %119, %120 : vector<8x1xf32>
    %122 = vector.broadcast %121 : vector<8x1xf32> to vector<8x8xf32>
    %123 = arith.divf %117, %122 : vector<8x8xf32>
    %cst_62 = arith.constant dense<0.000000e+00> : vector<8x8xf32>
    %124 = tpu.matmul %123, %113, %cst_62 {dimension_numbers = #tpu.dot_dimension_numbers<[1], [0], [0], [1], [0, 0, 1, 1], [], []>} : vector<8x8xf32>, vector<8x8xf32>, vector<8x8xf32> -> vector<8x8xf32>
    %c1_63 = arith.constant 1 : index
    %c0_64 = arith.constant 0 : index
    %c0_65 = arith.constant 0 : index
    %c0_66 = arith.constant 0 : index
    %125 = vector.load %arg11[%c1_63, %c0_64, %c0_65, %c0_66] : memref<2x4x8x8xf32, #tpu.memory_space<vmem>>, vector<1x1x8x8xf32>
    %126 = vector.shape_cast %125 : vector<1x1x8x8xf32> to vector<8x8xf32>
    %127 = vector.shape_cast %123 : vector<8x8xf32> to vector<1x1x8x8xf32>
    tpu.vector_store %arg11[%c1_63, %c0_64, %c0_65, %c0_66], %127 {strides = array<i32>} : memref<2x4x8x8xf32, #tpu.memory_space<vmem>>, vector<1x1x8x8xf32>,
    %128 = vector.extract_strided_slice %11 {offsets = [1, 0, 8], sizes = [1, 8, 8], strides = [1, 1, 1]} : vector<2x8x32xf32> to vector<1x8x8xf32>
    %129 = vector.shape_cast %128 : vector<1x8x8xf32> to vector<8x8xf32>
    %130 = vector.extract_strided_slice %17 {offsets = [1, 0, 8], sizes = [1, 8, 8], strides = [1, 1, 1]} : vector<2x8x32xf32> to vector<1x8x8xf32>
    %131 = vector.shape_cast %130 : vector<1x8x8xf32> to vector<8x8xf32>
    %132 = vector.extract_strided_slice %23 {offsets = [1, 0, 8], sizes = [1, 8, 8], strides = [1, 1, 1]} : vector<2x8x32xf32> to vector<1x8x8xf32>
    %133 = vector.shape_cast %132 : vector<1x8x8xf32> to vector<8x8xf32>
    %cst_67 = arith.constant dense<0.000000e+00> : vector<8x8xf32>
    %134 = tpu.matmul %129, %131, %cst_67 {dimension_numbers = #tpu.dot_dimension_numbers<[1], [1], [0], [0], [0, 0, 1, 0], [], []>} : vector<8x8xf32>, vector<8x8xf32>, vector<8x8xf32> -> vector<8x8xf32>
    %cst_68 = arith.constant 0.353553385 : f32
    %135 = vector.broadcast %cst_68 : f32 to vector<8x8xf32>
    %136 = arith.mulf %134, %135 : vector<8x8xf32>
    %137 = math.exp %136 : vector<8x8xf32>
    %cst_69 = arith.constant dense<0.000000e+00> : vector<8xf32>
    %138 = vector.multi_reduction <add>, %137, %cst_69 [1] : vector<8x8xf32> to vector<8xf32>
    %139 = vector.shape_cast %138 : vector<8xf32> to vector<8x1xf32>
    %cst_70 = arith.constant 9.99999993E-9 : f32
    %140 = vector.broadcast %cst_70 : f32 to vector<8x1xf32>
    %141 = arith.addf %139, %140 : vector<8x1xf32>
    %142 = vector.broadcast %141 : vector<8x1xf32> to vector<8x8xf32>
    %143 = arith.divf %137, %142 : vector<8x8xf32>
    %cst_71 = arith.constant dense<0.000000e+00> : vector<8x8xf32>
    %144 = tpu.matmul %143, %133, %cst_71 {dimension_numbers = #tpu.dot_dimension_numbers<[1], [0], [0], [1], [0, 0, 1, 1], [], []>} : vector<8x8xf32>, vector<8x8xf32>, vector<8x8xf32> -> vector<8x8xf32>
    %c1_72 = arith.constant 1 : index
    %c1_73 = arith.constant 1 : index
    %c0_74 = arith.constant 0 : index
    %c0_75 = arith.constant 0 : index
    %145 = vector.load %arg11[%c1_72, %c1_73, %c0_74, %c0_75] : memref<2x4x8x8xf32, #tpu.memory_space<vmem>>, vector<1x1x8x8xf32>
    %146 = vector.shape_cast %145 : vector<1x1x8x8xf32> to vector<8x8xf32>
    %147 = vector.shape_cast %143 : vector<8x8xf32> to vector<1x1x8x8xf32>
    tpu.vector_store %arg11[%c1_72, %c1_73, %c0_74, %c0_75], %147 {strides = array<i32>} : memref<2x4x8x8xf32, #tpu.memory_space<vmem>>, vector<1x1x8x8xf32>,
    %148 = vector.extract_strided_slice %11 {offsets = [1, 0, 16], sizes = [1, 8, 8], strides = [1, 1, 1]} : vector<2x8x32xf32> to vector<1x8x8xf32>
    %149 = vector.shape_cast %148 : vector<1x8x8xf32> to vector<8x8xf32>
    %150 = vector.extract_strided_slice %17 {offsets = [1, 0, 16], sizes = [1, 8, 8], strides = [1, 1, 1]} : vector<2x8x32xf32> to vector<1x8x8xf32>
    %151 = vector.shape_cast %150 : vector<1x8x8xf32> to vector<8x8xf32>
    %152 = vector.extract_strided_slice %23 {offsets = [1, 0, 16], sizes = [1, 8, 8], strides = [1, 1, 1]} : vector<2x8x32xf32> to vector<1x8x8xf32>
    %153 = vector.shape_cast %152 : vector<1x8x8xf32> to vector<8x8xf32>
    %cst_76 = arith.constant dense<0.000000e+00> : vector<8x8xf32>
    %154 = tpu.matmul %149, %151, %cst_76 {dimension_numbers = #tpu.dot_dimension_numbers<[1], [1], [0], [0], [0, 0, 1, 0], [], []>} : vector<8x8xf32>, vector<8x8xf32>, vector<8x8xf32> -> vector<8x8xf32>
    %cst_77 = arith.constant 0.353553385 : f32
    %155 = vector.broadcast %cst_77 : f32 to vector<8x8xf32>
    %156 = arith.mulf %154, %155 : vector<8x8xf32>
    %157 = math.exp %156 : vector<8x8xf32>
    %cst_78 = arith.constant dense<0.000000e+00> : vector<8xf32>
    %158 = vector.multi_reduction <add>, %157, %cst_78 [1] : vector<8x8xf32> to vector<8xf32>
    %159 = vector.shape_cast %158 : vector<8xf32> to vector<8x1xf32>
    %cst_79 = arith.constant 9.99999993E-9 : f32
    %160 = vector.broadcast %cst_79 : f32 to vector<8x1xf32>
    %161 = arith.addf %159, %160 : vector<8x1xf32>
    %162 = vector.broadcast %161 : vector<8x1xf32> to vector<8x8xf32>
    %163 = arith.divf %157, %162 : vector<8x8xf32>
    %cst_80 = arith.constant dense<0.000000e+00> : vector<8x8xf32>
    %164 = tpu.matmul %163, %153, %cst_80 {dimension_numbers = #tpu.dot_dimension_numbers<[1], [0], [0], [1], [0, 0, 1, 1], [], []>} : vector<8x8xf32>, vector<8x8xf32>, vector<8x8xf32> -> vector<8x8xf32>
    %c1_81 = arith.constant 1 : index
    %c2_82 = arith.constant 2 : index
    %c0_83 = arith.constant 0 : index
    %c0_84 = arith.constant 0 : index
    %165 = vector.load %arg11[%c1_81, %c2_82, %c0_83, %c0_84] : memref<2x4x8x8xf32, #tpu.memory_space<vmem>>, vector<1x1x8x8xf32>
    %166 = vector.shape_cast %165 : vector<1x1x8x8xf32> to vector<8x8xf32>
    %167 = vector.shape_cast %163 : vector<8x8xf32> to vector<1x1x8x8xf32>
    tpu.vector_store %arg11[%c1_81, %c2_82, %c0_83, %c0_84], %167 {strides = array<i32>} : memref<2x4x8x8xf32, #tpu.memory_space<vmem>>, vector<1x1x8x8xf32>,
    %168 = vector.extract_strided_slice %11 {offsets = [1, 0, 24], sizes = [1, 8, 8], strides = [1, 1, 1]} : vector<2x8x32xf32> to vector<1x8x8xf32>
    %169 = vector.shape_cast %168 : vector<1x8x8xf32> to vector<8x8xf32>
    %170 = vector.extract_strided_slice %17 {offsets = [1, 0, 24], sizes = [1, 8, 8], strides = [1, 1, 1]} : vector<2x8x32xf32> to vector<1x8x8xf32>
    %171 = vector.shape_cast %170 : vector<1x8x8xf32> to vector<8x8xf32>
    %172 = vector.extract_strided_slice %23 {offsets = [1, 0, 24], sizes = [1, 8, 8], strides = [1, 1, 1]} : vector<2x8x32xf32> to vector<1x8x8xf32>
    %173 = vector.shape_cast %172 : vector<1x8x8xf32> to vector<8x8xf32>
    %cst_85 = arith.constant dense<0.000000e+00> : vector<8x8xf32>
    %174 = tpu.matmul %169, %171, %cst_85 {dimension_numbers = #tpu.dot_dimension_numbers<[1], [1], [0], [0], [0, 0, 1, 0], [], []>} : vector<8x8xf32>, vector<8x8xf32>, vector<8x8xf32> -> vector<8x8xf32>
    %cst_86 = arith.constant 0.353553385 : f32
    %175 = vector.broadcast %cst_86 : f32 to vector<8x8xf32>
    %176 = arith.mulf %174, %175 : vector<8x8xf32>
    %177 = math.exp %176 : vector<8x8xf32>
    %cst_87 = arith.constant dense<0.000000e+00> : vector<8xf32>
    %178 = vector.multi_reduction <add>, %177, %cst_87 [1] : vector<8x8xf32> to vector<8xf32>
    %179 = vector.shape_cast %178 : vector<8xf32> to vector<8x1xf32>
    %cst_88 = arith.constant 9.99999993E-9 : f32
    %180 = vector.broadcast %cst_88 : f32 to vector<8x1xf32>
    %181 = arith.addf %179, %180 : vector<8x1xf32>
    %182 = vector.broadcast %181 : vector<8x1xf32> to vector<8x8xf32>
    %183 = arith.divf %177, %182 : vector<8x8xf32>
    %cst_89 = arith.constant dense<0.000000e+00> : vector<8x8xf32>
    %184 = tpu.matmul %183, %173, %cst_89 {dimension_numbers = #tpu.dot_dimension_numbers<[1], [0], [0], [1], [0, 0, 1, 1], [], []>} : vector<8x8xf32>, vector<8x8xf32>, vector<8x8xf32> -> vector<8x8xf32>
    %c1_90 = arith.constant 1 : index
    %c3_91 = arith.constant 3 : index
    %c0_92 = arith.constant 0 : index
    %c0_93 = arith.constant 0 : index
    %185 = vector.load %arg11[%c1_90, %c3_91, %c0_92, %c0_93] : memref<2x4x8x8xf32, #tpu.memory_space<vmem>>, vector<1x1x8x8xf32>
    %186 = vector.shape_cast %185 : vector<1x1x8x8xf32> to vector<8x8xf32>
    %187 = vector.shape_cast %183 : vector<8x8xf32> to vector<1x1x8x8xf32>
    tpu.vector_store %arg11[%c1_90, %c3_91, %c0_92, %c0_93], %187 {strides = array<i32>} : memref<2x4x8x8xf32, #tpu.memory_space<vmem>>, vector<1x1x8x8xf32>,
    %188 = tpu.concatenate %124, %144, %164, %184 in 1 : vector<8x8xf32>, vector<8x8xf32>, vector<8x8xf32>, vector<8x8xf32> -> vector<8x32xf32>
    %c1_94 = arith.constant 1 : index
    %c0_95 = arith.constant 0 : index
    %c0_96 = arith.constant 0 : index
    %189 = vector.load %arg10[%c1_94, %c0_95, %c0_96] : memref<2x8x32xf32, #tpu.memory_space<vmem>>, vector<1x8x32xf32>
    %190 = vector.shape_cast %189 : vector<1x8x32xf32> to vector<8x32xf32>
    %191 = vector.shape_cast %188 : vector<8x32xf32> to vector<1x8x32xf32>
    tpu.vector_store %arg10[%c1_94, %c0_95, %c0_96], %191 {strides = array<i32>} : memref<2x8x32xf32, #tpu.memory_space<vmem>>, vector<1x8x32xf32>,
    return
  }
  func.func @transform_0(%arg0: i32) -> (i32, i32, i32) {
    %c0_i32 = arith.constant 0 : i32
    %c0_i32_0 = arith.constant 0 : i32
    %c0_i32_1 = arith.constant 0 : i32
    return %arg0, %c0_i32, %c0_i32_0 : i32, i32, i32
  }
  func.func @transform_1(%arg0: i32) -> (i32, i32, i32) {
    %c0_i32 = arith.constant 0 : i32
    %c0_i32_0 = arith.constant 0 : i32
    %c0_i32_1 = arith.constant 0 : i32
    return %arg0, %c0_i32, %c0_i32_0 : i32, i32, i32
  }
  func.func @transform_2(%arg0: i32) -> (i32, i32, i32) {
    %c0_i32 = arith.constant 0 : i32
    %c0_i32_0 = arith.constant 0 : i32
    %c0_i32_1 = arith.constant 0 : i32
    return %arg0, %c0_i32, %c0_i32_0 : i32, i32, i32
  }
  func.func @transform_3(%arg0: i32) -> (i32, i32) {
    %c0_i32 = arith.constant 0 : i32
    %c0_i32_0 = arith.constant 0 : i32
    %c0_i32_1 = arith.constant 0 : i32
    return %c0_i32, %c0_i32_0 : i32, i32
  }
  func.func @transform_4(%arg0: i32) -> (i32, i32) {
    %c0_i32 = arith.constant 0 : i32
    %c0_i32_0 = arith.constant 0 : i32
    %c0_i32_1 = arith.constant 0 : i32
    return %c0_i32, %c0_i32_0 : i32, i32
  }
  func.func @transform_5(%arg0: i32) -> (i32, i32) {
    %c0_i32 = arith.constant 0 : i32
    %c0_i32_0 = arith.constant 0 : i32
    %c0_i32_1 = arith.constant 0 : i32
    return %c0_i32, %c0_i32_0 : i32, i32
  }
  func.func @transform_6(%arg0: i32) -> (i32, i32) {
    %c0_i32 = arith.constant 0 : i32
    %c0_i32_0 = arith.constant 0 : i32
    %c0_i32_1 = arith.constant 0 : i32
    return %c0_i32, %c0_i32_0 : i32, i32
  }
  func.func @transform_7(%arg0: i32) -> (i32, i32) {
    %c0_i32 = arith.constant 0 : i32
    %c0_i32_0 = arith.constant 0 : i32
    %c0_i32_1 = arith.constant 0 : i32
    return %c0_i32, %c0_i32_0 : i32, i32
  }
  func.func @transform_8(%arg0: i32) -> (i32, i32) {
    %c0_i32 = arith.constant 0 : i32
    %c0_i32_0 = arith.constant 0 : i32
    %c0_i32_1 = arith.constant 0 : i32
    return %c0_i32, %c0_i32_0 : i32, i32
  }
  func.func @transform_9(%arg0: i32) -> (i32, i32, i32) {
    %c0_i32 = arith.constant 0 : i32
    %c0_i32_0 = arith.constant 0 : i32
    %c0_i32_1 = arith.constant 0 : i32
    return %arg0, %c0_i32, %c0_i32_0 : i32, i32, i32
  }
  func.func @transform_10(%arg0: i32) -> (i32, i32, i32, i32) {
    %c0_i32 = arith.constant 0 : i32
    %c0_i32_0 = arith.constant 0 : i32
    %c0_i32_1 = arith.constant 0 : i32
    %c0_i32_2 = arith.constant 0 : i32
    return %arg0, %c0_i32, %c0_i32_0, %c0_i32_1 : i32, i32, i32, i32
  }
}

</mosaic_0001>

<bundles_post_ra>
// kernel: tpu_custom_call.1
= control target key start
LH: loop header
LB: loop body
LE: loop exit
PB: predicated region body
PF: predicated region fallthrough
CT: control target
= control target key end

     0   :  { %16 = vsyncpa [#allocation3], 0  ;;  %s1486_s0 = inlined_call_operand.hbm [shape: f32[2,8,32], index: 0, kind: input, shape index: {}]   ;;  %s1487_s1 = inlined_call_operand.hbm [shape: f32[2,8,32], index: 1, kind: input, shape index: {}]   ;;  %s1488_s2 = inlined_call_operand.hbm [shape: f32[2,8,32], index: 2, kind: input, shape index: {}]   ;;  %s1489_s3 = inlined_call_operand.hbm [shape: f32[32,32], index: 3, kind: input, shape index: {}]   ;;  %s1490_s4 = inlined_call_operand.hbm [shape: f32[32,32], index: 4, kind: input, shape index: {}]   ;;  %s1491_s5 = inlined_call_operand.hbm [shape: f32[32,32], index: 5, kind: input, shape index: {}]   ;;  %s1492_s6 = inlined_call_operand.vmem [shape: f32[1,32], index: 6, kind: input, shape index: {}]   ;;  %s1493_s7 = inlined_call_operand.vmem [shape: f32[1,32], index: 7, kind: input, shape index: {}]   ;;  %s1494_s8 = inlined_call_operand.vmem [shape: f32[1,32], index: 8, kind: input, shape index: {}]   ;;  %s1495_s9 = inlined_call_operand.hbm [shape: f32[2,8,32], index: 9, kind: output, shape index: {0}]   ;;  %s1496_s10 = inlined_call_operand.hbm [shape: f32[2,4,8,8], index: 10, kind: output, shape index: {1}]  }
   0x1   :  { %17 = vsyncpa [#allocation6], 0 }
   0x2   :  { %18 = vsyncpa [#allocation9], 0 }
   0x3   :  { %19 = vsyncpa [#allocation12], 0 }
   0x4   :  { %20 = vsyncpa [#allocation4], 0 }
   0x5   :  { %21 = vsyncpa [#allocation15], 0  ;;  %s39_s15 = sshll.u32 %s1487_s1, 4  ;;  %s1223_s16 = smov [#allocation5]   ;;  %s40_s15 = int_to_ptr.hbm [resolvable:$true] %s39_s15 }
   0x6   :  { %s41_s17 = sshll.u32 %s1223_s16, 4  ;;  %s65_s20 = sshll.u32 %s1489_s3, 4  ;;  %s42_s17 = int_to_ptr.vmem [resolvable:$true] %s41_s17  ;;  %s66_s20 = int_to_ptr.hbm [resolvable:$true] %s65_s20 }
   0x7   :  { %s1224_s21 = smov 128   ;;  %s1225_s22 = smov 8  }
   0x8   :  { %47 = dma.hbm_to_vmem [thread:$0]  %s40_s15, 256, %s42_s17, [#allocation6], %s1224_s21, %s1224_s21, %s1225_s22  }
   0x9   :  { %s1226_s23 = smov [#allocation8]   ;;  %s26_s1 = sshll.u32 %s1486_s0, 4  ;;  %s27_s1 = int_to_ptr.hbm [resolvable:$true] %s26_s1 }
   0xa   :  { %s67_s24 = sshll.u32 %s1226_s23, 4  ;;  %s52_s28 = sshll.u32 %s1488_s2, 4  ;;  %s68_s24 = int_to_ptr.vmem [resolvable:$true] %s67_s24  ;;  %s53_s28 = int_to_ptr.hbm [resolvable:$true] %s52_s28 }
   0xb   :  { %73 = dma.hbm_to_vmem [thread:$0]  %s66_s20, 512, %s68_s24, [#allocation9], %s1224_s21, %s1224_s21, %s1225_s22  }
   0xc   :  { %s1227_s29 = smov [#allocation2]   ;;  %s1228_s11 = smov [#allocation7]  }
   0xd   :  { %s28_s30 = sshll.u32 %s1227_s29, 4  ;;  %s54_s0 = sshll.u32 %s1228_s11, 4  ;;  %s29_s30 = int_to_ptr.vmem [resolvable:$true] %s28_s30  ;;  %s55_s0 = int_to_ptr.vmem [resolvable:$true] %s54_s0 }
   0xe   :  { %34 = dma.hbm_to_vmem [thread:$0]  %s27_s1, 256, %s29_s30, [#allocation3], %s1224_s21, %s1224_s21, %s1225_s22  }
   0xf   :  { %s78_s14 = sshll.u32 %s1490_s4, 4  ;;  %s91_s16 = sshll.u32 %s1491_s5, 4  ;;  %s79_s14 = int_to_ptr.hbm [resolvable:$true] %s78_s14  ;;  %s92_s16 = int_to_ptr.hbm [resolvable:$true] %s91_s16 }
  0x10   :  { %60 = dma.hbm_to_vmem [thread:$0]  %s53_s28, 256, %s55_s0, [#allocation6], %s1224_s21, %s1224_s21, %s1225_s22  }
  0x11   :  { %s1229_s17 = smov [#allocation10]   ;;  %s1230_s19 = smov [#allocation11]  }
  0x12   :  { %s80_s18 = sshll.u32 %s1229_s17, 4  ;;  %s93_s4 = sshll.u32 %s1230_s19, 4  ;;  %s81_s18 = int_to_ptr.vmem [resolvable:$true] %s80_s18  ;;  %s94_s4 = int_to_ptr.vmem [resolvable:$true] %s93_s4 }
  0x13   :  { %86 = dma.hbm_to_vmem [thread:$0]  %s79_s14, 512, %s81_s18, [#allocation9], %s1224_s21, %s1224_s21, %s1225_s22  }
  0x14   :  { %99 = dma.hbm_to_vmem [thread:$0]  %s92_s16, 512, %s94_s4, [#allocation12], %s1224_s21, %s1224_s21, %s1225_s22  }
  0x15   :  { %1211 = dma.done.wait [#allocation3], 256  }
  0x16   :  { %1212 = vsyncadd [#allocation3], 4294967040 }
  0x17   :  { %1213 = dma.done.wait [#allocation6], 512  }
  0x18   :  { %1214 = vsyncadd [#allocation6], 4294966784 }
  0x19   :  { %1215 = dma.done.wait [#allocation9], 1024  }
  0x1a   :  { %1216 = vsyncadd [#allocation9], 4294966272 }
  0x1b   :  { %1217 = dma.done.wait [#allocation12], 512  }
  0x1c   :  { %1218 = vsyncadd [#allocation12], 4294966784  ;;  %v139_v0 = vld [vmem:[#allocation8 + $0x18] sm:$0xff]  ;;  %v138_v2 = vld [vmem:[#allocation8 + $0x10] sm:$0xff]  ;;  %vm144_vm0 = vcmask 261120   ;;  %vm248_vm1 = vcmask 64512  }
  0x1d   :  { %v177_v1 = vld [vmem:[#allocation10 + $0x18] sm:$0xff]  ;;  %163 = vmatpush.msra.mxu0 %v139_v0  ;;  %v176_v3 = vld [vmem:[#allocation10 + $0x10] sm:$0xff]  ;;  %v137_v4 = vld [vmem:[#allocation8 + $0x8] sm:$0xff]  ;;  %s1231_s25 = smov 104   ;;  %s1232_s26 = smov 120  }
  0x1e   :  { %200 = vmatpush.msra.mxu1 %v177_v1  ;;  %v175_v5 = vld [vmem:[#allocation10 + $0x8] sm:$0xff]  ;;  %v136_v6 = vld [vmem:[#allocation8] sm:$0xff]  ;;  %v130_v8 = vld [vmem:[#allocation2] sm:$0xff]  ;;  %s1235_s3 = smov 24   ;;  %s1236_s27 = smov [#allocation14]  }
  0x1f   :  { %164 = vmatpush.msra.mxu0 %v138_v2  ;;  %v174_v7 = vld [vmem:[#allocation10] sm:$0xff]  ;;  %v131_v10 = vld [vmem:[#allocation2 + $0x8] sm:$0xff]  ;;  %v133_v11 = vld [vmem:[#allocation5 + $0x8] sm:$0xff]  ;;  %s916_s28 = sshll.u32 %s1236_s27, 4  ;;  %s918_s11 = sshll.u32 %s1496_s10, 4  ;;  %s917_s28 = int_to_ptr.vmem [resolvable:$true] %s916_s28  ;;  %s919_s11 = int_to_ptr.hbm [resolvable:$true] %s918_s11 }
  0x20   :  { %201 = vmatpush.msra.mxu1 %v176_v3  ;;  %v132_v9 = vld [vmem:[#allocation5] sm:$0xff]  ;;  %v984_v12 = vld [vmem:[%s1492_s6] ss:$0 sm:$0xff]  ;;  %v214_v18 = vld [vmem:[#allocation11 + $0x18] sm:$0xff]  ;;  %s1233_s6 = smov 112   ;;  %s1237_s10 = smov [#allocation13]  }
  0x21   :  { %165 = vmatpush.msra.mxu0 %v137_v4  ;;  %v985_v13 = vld [vmem:[%s1493_s7] ss:$0 sm:$0xff]  ;;  %237 = vmatpush.msra.mxu2 %v214_v18  ;;  %v212_v24 = vld [vmem:[#allocation11 + $0x8] sm:$0xff]  ;;  %v211_v25 = vld [vmem:[#allocation11] sm:$0xff]  ;;  %s903_s0 = sshll.u32 %s1237_s10, 4  ;;  %s905_s14 = sshll.u32 %s1495_s9, 4  ;;  %s904_s0 = int_to_ptr.vmem [resolvable:$true] %s903_s0  ;;  %s906_s14 = int_to_ptr.hbm [resolvable:$true] %s905_s14 }
  0x22   :  { %202 = vmatpush.msra.mxu1 %v175_v5  ;;  %v213_v23 = vld [vmem:[#allocation11 + $0x10] sm:$0xff]  ;;  %v135_v44 = vld [vmem:[#allocation7 + $0x8] sm:$0xff] }
  0x23   :  { %166 = vmatpush.msra.mxu0 %v136_v6  ;;  %238 = vmatpush.msra.mxu2 %v213_v23  ;;  %v134_v26 = vld [vmem:[#allocation7] sm:$0xff] }
  0x24   :  { %203 = vmatpush.msra.mxu1 %v174_v7  ;;  %939 = vmatmul.msk.f32.vlgmr.msra.gmra.mxu0 %vm144_vm0, %v130_v8  ;;  %v1374_v41 = vld [vmem:[%s1494_s8] ss:$0 sm:$0xff]  ;;  %s1234_s8 = smov 16  }
  0x25   :  { %941 = vmatmul.msk.f32.vlgmr.msra.gmra.mxu1 %vm144_vm0, %v132_v9  ;;  %239 = vmatpush.msra.mxu2 %v212_v24 }
  0x27   :  { %240 = vmatpush.msra.mxu2 %v211_v25 }
  0x28   :  { %943 = vmatmul.msk.f32.vlgmr.msra.gmra.mxu2 %vm144_vm0, %v134_v26 }
  0x2c   :  { %940 = vmatmul.msk.f32.gmra.mxu0 %vm144_vm0, %v131_v10 }
  0x2d   :  { %942 = vmatmul.msk.f32.gmra.mxu1 %vm144_vm0, %v133_v11 }
  0x30   :  { %944 = vmatmul.msk.f32.gmra.mxu2 %vm144_vm0, %v135_v44 }
  0xa1   :  { %v168_v14 = vpop.f32.mrf.mxu0 }
  0xa2   :  { %v205_v15 = vpop.f32.mrf.mxu1  ;;  %v169_v16 = vadd.f32 %v984_v12, %v168_v14 }
  0xa3   :  { %v206_v17 = vadd.f32 %v985_v13, %v205_v15 }
  0xa4   :  { %321 = vrot.lane.b32.xlu1 %v169_v16, %s1232_s26 }
  0xa5   :  { %480 = vrot.lane.b32.xlu2 %v206_v17, %s1231_s25  ;;  %945 = vmatpush.xpose.msk.msra.mxu3 %vm248_vm1, %v206_v17 }
  0xa8   :  { %946 = vmatmul.msk.f32.vlgmr.msra.gmra.mxu3 %vm248_vm1, %v169_v16 }
  0xa9   :  { %v171_v21 = vpop.f32.mrf.mxu0 }
  0xaa   :  { %v208_v19 = vpop.f32.mrf.mxu1  ;;  %v172_v22 = vadd.f32 %v984_v12, %v171_v21 }
  0xab   :  { %v209_v20 = vadd.f32 %v985_v13, %v208_v19  ;;  %v242_v42 = vpop.f32.mrf.mxu2 }
  0xac   :  { %402 = vrot.lane.b32.xlu1 %v206_v17, %s1233_s6  ;;  %v1377_v43 = vadd.f32 %v1374_v41, %v242_v42 }
  0xad   :  { %400 = vrot.lane.b32.xlu2 %v169_v16, %s1233_s6 }
  0xae   :  { %315 = vmatpush.msrb.mxu3 %v1377_v43 }
  0xb3   :  { %v245_v14 = vpop.f32.mrf.mxu2 }
  0xb4   :  { %478 = vrot.lane.b32.xlu1 %v169_v16, %s1231_s25  ;;  %v1413_v15 = vadd.f32 %v1374_v41, %v245_v14 }
  0xb5   :  { %649 = vrot.lane.b32.xlu2 %v209_v20, %s1232_s26 }
  0xbc   :  { %647 = vrot.lane.b32.xlu1 %v172_v22, %s1232_s26 }
  0xbd   :  { %728 = vrot.lane.b32.xlu2 %v209_v20, %s1233_s6 }
  0xc4   :  { %726 = vrot.lane.b32.xlu1 %v172_v22, %s1233_s6 }
  0xc5   :  { %804 = vrot.lane.b32.xlu2 %v172_v22, %s1231_s25 }
  0xcd   :  { %450 = vrot.lane.b32.xlu2 %v1377_v43, %s1233_s6 }
  0xff   :  { %v1352_v27 = vpop.permute.xlu2 %480 }
 0x107   :  { %v401_v28 = vpop.permute.xlu2 %400 }
 0x10f   :  { %v1356_v30 = vpop.permute.xlu2 %649 }
 0x116   :  { %v1354_v29 = vpop.permute.xlu1 %321 }
 0x117   :  { %v729_v32 = vpop.permute.xlu2 %728 }
 0x11e   :  { %v403_v31 = vpop.permute.xlu1 %402 }
 0x11f   :  { %951 = vmatpush.xpose.msk.msrb.mxu1 %vm248_vm1, %v403_v31  ;;  %v805_v4 = vpop.permute.xlu2 %804 }
 0x122   :  { %952 = vmatmul.msk.f32.vlgmr.msrb.gmra.mxu1 %vm248_vm1, %v401_v28 }
 0x123   :  { %957 = vmatpush.xpose.msk.msra.mxu1 %vm248_vm1, %v209_v20 }
 0x126   :  { %v1362_v33 = vpop.permute.xlu1 %478 }
 0x127   :  { %963 = vmatpush.xpose.msk.msrb.mxu1 %vm248_vm1, %v729_v32  ;;  %v451_v11 = vpop.permute.xlu2 %450 }
 0x128   :  { %471 = vmatpush.msrb.mxu2 %v451_v11 }
 0x12a   :  { %958 = vmatmul.msk.f32.vlgmr.msra.gmra.mxu1 %vm248_vm1, %v172_v22  ;;  %640 = vmatpush.msra.mxu2 %v1413_v15 }
 0x12b   :  { %v272_v34 = vpop.f32.mrf.mxu3 }
 0x12c   :  { %v275_v35 = vmul.f32 0.35355338, %v272_v34 }
 0x12e   :  { %v276_v36 = vmul.f32 1.442695, %v275_v35  ;;  %v1365_v37 = vpop.permute.xlu1 %647 }
 0x130   :  { %987 = vpow2.f32 %v276_v36 }
 0x136   :  { %v988_v38 = vpop.eup %987  ;;  %v727_v40 = vpop.permute.xlu1 %726 }
 0x137   :  { %v278_v39 = vsel %vm248_vm1, %v988_v38, 0.0  ;;  %964 = vmatmul.msk.f32.vlgmr.msrb.gmra.mxu1 %vm248_vm1, %v727_v40 }
 0x138   :  { %279 = vadd.xlane.f32.xlu0 %v278_v39 }
 0x14c   :  { %323 = vrot.lane.b32.xlu0 %v206_v17, %s1232_s26 }
 0x154   :  { %806 = vrot.lane.b32.xlu0 %v209_v20, %s1231_s25 }
 0x15c   :  { %372 = vrot.lane.b32.xlu0 %v1377_v43, %s1232_s26 }
 0x19f   :  { %v425_v45 = vpop.f32.mrf.mxu1 }
 0x1a0   :  { %v428_v46 = vmul.f32 0.35355338, %v425_v45 }
 0x1a2   :  { %v429_v47 = vmul.f32 1.442695, %v428_v46 }
 0x1a4   :  { %989 = vpow2.f32 %v429_v47 }
 0x1a7   :  { %v597_v48 = vpop.f32.mrf.mxu1 }
 0x1a8   :  { %v600_v49 = vmul.f32 0.35355338, %v597_v48 }
 0x1aa   :  { %v1385_v51 = vpop.eup %989  ;;  %v601_v52 = vmul.f32 1.442695, %v600_v49 }
 0x1ab   :  { %v280_v50 = vpop.xlane.xlu0 %279  ;;  %v431_v54 = vsel %vm248_vm1, %v1385_v51, 0.0 }
 0x1ac   :  { %v281_v53 = vadd.f32 1e-08, %v280_v50  ;;  %991 = vpow2.f32 %v601_v52  ;;  %432 = vadd.xlane.f32.xlu1 %v431_v54 }
 0x1ae   :  { %993 = vrcp.f32 %v281_v53  ;;  %v293_v62 = vand.u32 2147483648, %v281_v53  ;;  %v291_v1 = vand.u32 2147483647, %v281_v53  ;;  %vm287_vm3 = vweird.f32 %v281_v53 }
 0x1b0   :  { %v294_v3 = vor.u32 1.1754944e-38, %v293_v62  ;;  %vm292_vm5 = vcmp.eq.f32.partialorder %v291_v1, 8.507059e+37 }
 0x1b2   :  { %v1389_v55 = vpop.eup %991 }
 0x1b3   :  { %v603_v57 = vsel %vm248_vm1, %v1389_v55, 0.0 }
 0x1b4   :  { %v994_v56 = vpop.eup %993  ;;  %604 = vadd.xlane.f32.xlu0 %v603_v57  ;;  %v751_v59 = vpop.f32.mrf.mxu1 }
 0x1b5   :  { %v283_v58 = vmul.f32 %v994_v56, %v281_v53  ;;  %v754_v60 = vmul.f32 0.35355338, %v751_v59  ;;  %vm288_vm2 = vweird.f32 %v994_v56 }
 0x1b6   :  { %vm289_vm4 = vmor %vm287_vm3, %vm288_vm2 }
 0x1b7   :  { %v284_v61 = vsub.f32 1.0, %v283_v58  ;;  %v755_v63 = vmul.f32 1.442695, %v754_v60 }
 0x1b9   :  { %v285_v0 = vmul.f32 %v994_v56, %v284_v61  ;;  %995 = vpow2.f32 %v755_v63 }
 0x1bb   :  { %v286_v2 = vadd.f32 %v994_v56, %v285_v0 }
 0x1bd   :  { %v290_v6 = vsel %vm289_vm4, %v994_v56, %v286_v2 }
 0x1be   :  { %v324_v5 = vpop.permute.xlu0 %323  ;;  %v295_v7 = vsel %vm292_vm5, %v294_v3, %v290_v6 }
 0x1bf   :  { %948 = vmatpush.xpose.msk.msra.mxu3 %vm248_vm1, %v324_v5  ;;  %v296_v8 = vmul.f32 %v988_v38, %v295_v7  ;;  %v1394_v9 = vpop.eup %995 }
 0x1c0   :  { %v757_v10 = vsel %vm248_vm1, %v1394_v9, 0.0 }
 0x1c1   :  { %947 = vmatmul.msk.f32.vlgmr.msrb.gmra.mxu3 %vm248_vm1, %v296_v8  ;;  %320 = vst.msk [vmem:[#allocation14] sm:$0xff] %vm248_vm1, %v296_v8  ;;  %758 = vadd.xlane.f32.xlu1 %v757_v10 }
 0x1c3   :  { %954 = vmatpush.xpose.msk.msrb.mxu3 %vm248_vm1, %v1352_v27 }
 0x1c6   :  { %v807_v12 = vpop.permute.xlu0 %806 }
 0x1c9   :  { %949 = vmatmul.msk.f32.vlgmr.msra.gmra.mxu3 %vm248_vm1, %v1354_v29 }
 0x1ca   :  { %960 = vmatpush.xpose.msk.msra.mxu3 %vm248_vm1, %v1356_v30 }
 0x1ce   :  { %v373_v13 = vpop.permute.xlu0 %372 }
 0x1cf   :  { %393 = vmatpush.msrb.mxu0 %v373_v13 }
 0x1d1   :  { %955 = vmatmul.msk.f32.vlgmr.msrb.gmra.mxu3 %vm248_vm1, %v1362_v33 }
 0x1d2   :  { %966 = vmatpush.xpose.msk.msrb.mxu3 %vm248_vm1, %v807_v12 }
 0x1d9   :  { %961 = vmatmul.msk.f32.vlgmr.msra.gmra.mxu3 %vm248_vm1, %v1365_v37 }
 0x1e1   :  { %967 = vmatmul.msk.f32.vlgmr.msrb.gmra.mxu3 %vm248_vm1, %v805_v4 }
 0x21f   :  { %v433_v16 = vpop.xlane.xlu1 %432 }
 0x220   :  { %v434_v17 = vadd.f32 1e-08, %v433_v16 }
 0x222   :  { %997 = vrcp.f32 %v434_v17  ;;  %v446_v23 = vand.u32 2147483648, %v434_v17  ;;  %v444_v25 = vand.u32 2147483647, %v434_v17  ;;  %vm440_vm7 = vweird.f32 %v434_v17 }
 0x224   :  { %v447_v28 = vor.u32 1.1754944e-38, %v446_v23  ;;  %vm445_vm9 = vcmp.eq.f32.partialorder %v444_v25, 8.507059e+37 }
 0x227   :  { %v605_v18 = vpop.xlane.xlu0 %604 }
 0x228   :  { %v998_v19 = vpop.eup %997  ;;  %v606_v20 = vadd.f32 1e-08, %v605_v18 }
 0x229   :  { %v436_v21 = vmul.f32 %v998_v19, %v434_v17  ;;  %vm441_vm6 = vweird.f32 %v998_v19 }
 0x22a   :  { %999 = vrcp.f32 %v606_v20  ;;  %vm442_vm8 = vmor %vm440_vm7, %vm441_vm6  ;;  %vm612_vm10 = vweird.f32 %v606_v20  ;;  %v618_v31 = vand.u32 2147483648, %v606_v20  ;;  %v616_v34 = vand.u32 2147483647, %v606_v20 }
 0x22b   :  { %v437_v22 = vsub.f32 1.0, %v436_v21 }
 0x22c   :  { %v619_v39 = vor.u32 1.1754944e-38, %v618_v31  ;;  %vm617_vm13 = vcmp.eq.f32.partialorder %v616_v34, 8.507059e+37 }
 0x22d   :  { %v438_v24 = vmul.f32 %v998_v19, %v437_v22 }
 0x22f   :  { %v439_v26 = vadd.f32 %v998_v19, %v438_v24 }
 0x230   :  { %v1000_v27 = vpop.eup %999 }
 0x231   :  { %v608_v29 = vmul.f32 %v1000_v27, %v606_v20  ;;  %v443_v30 = vsel %vm442_vm8, %v998_v19, %v439_v26  ;;  %vm613_vm11 = vweird.f32 %v1000_v27 }
 0x232   :  { %v448_v32 = vsel %vm445_vm9, %v447_v28, %v443_v30  ;;  %vm614_vm12 = vmor %vm612_vm10, %vm613_vm11 }
 0x233   :  { %v609_v33 = vsub.f32 1.0, %v608_v29  ;;  %v449_v35 = vmul.f32 %v1385_v51, %v448_v32 }
 0x234   :  { %v759_v36 = vpop.xlane.xlu1 %758 }
 0x235   :  { %v610_v37 = vmul.f32 %v1000_v27, %v609_v33  ;;  %953 = vmatmul.msk.f32.vlgmr.msrb.gmra.mxu2 %vm248_vm1, %v449_v35  ;;  %477 = vst.msk [vmem:[#allocation14 + $0x10] sm:$0xff] %vm248_vm1, %v449_v35  ;;  %v760_v38 = vadd.f32 1e-08, %v759_v36 }
 0x237   :  { %v611_v40 = vadd.f32 %v1000_v27, %v610_v37  ;;  %1001 = vrcp.f32 %v760_v38  ;;  %v772_v47 = vand.u32 2147483648, %v760_v38  ;;  %vm766_vm14 = vweird.f32 %v760_v38 }
 0x238   :  { %v770_v49 = vand.u32 2147483647, %v760_v38 }
 0x239   :  { %v615_v41 = vsel %vm614_vm12, %v1000_v27, %v611_v40  ;;  %v773_v52 = vor.u32 1.1754944e-38, %v772_v47 }
 0x23a   :  { %v620_v42 = vsel %vm617_vm13, %v619_v39, %v615_v41  ;;  %vm771_vm3 = vcmp.eq.f32.partialorder %v770_v49, 8.507059e+37 }
 0x23b   :  { %v621_v44 = vmul.f32 %v1389_v55, %v620_v42 }
 0x23d   :  { %v1002_v45 = vpop.eup %1001  ;;  %959 = vmatmul.msk.f32.vlgmr.msra.gmra.mxu2 %vm248_vm1, %v621_v44  ;;  %646 = vst.msk [vmem:[#allocation14 + $0x20] sm:$0xff] %vm248_vm1, %v621_v44 }
 0x23e   :  { %v762_v46 = vmul.f32 %v1002_v45, %v760_v38  ;;  %vm767_vm15 = vweird.f32 %v1002_v45 }
 0x23f   :  { %vm768_vm2 = vmor %vm766_vm14, %vm767_vm15 }
 0x240   :  { %v763_v48 = vsub.f32 1.0, %v762_v46 }
 0x242   :  { %v764_v50 = vmul.f32 %v1002_v45, %v763_v48 }
 0x244   :  { %v1422_v51 = vpop.f32.mrf.mxu3  ;;  %v765_v53 = vadd.f32 %v1002_v45, %v764_v50 }
 0x246   :  { %v769_v54 = vsel %vm768_vm2, %v1002_v45, %v765_v53 }
 0x247   :  { %v774_v55 = vsel %vm771_vm3, %v773_v52, %v769_v54 }
 0x248   :  { %v1425_v56 = vmul.f32 %v1394_v9, %v774_v55 }
 0x24a   :  { %803 = vst.msk [vmem:[#allocation14 + $0x30] sm:$0xff] %vm248_vm1, %v1425_v56 }
 0x24c   :  { %v346_v57 = vpop.f32.mrf.mxu3 }
 0x24d   :  { %v349_v58 = vmul.f32 0.35355338, %v346_v57 }
 0x24f   :  { %v350_v59 = vmul.f32 1.442695, %v349_v58 }
 0x251   :  { %1003 = vpow2.f32 %v350_v59 }
 0x254   :  { %v503_v60 = vpop.f32.mrf.mxu3 }
 0x255   :  { %v506_v61 = vmul.f32 0.35355338, %v503_v60 }
 0x257   :  { %v1004_v62 = vpop.eup %1003  ;;  %v507_v63 = vmul.f32 1.442695, %v506_v61 }
 0x258   :  { %v352_v0 = vsel %vm248_vm1, %v1004_v62, 0.0 }
 0x259   :  { %1005 = vpow2.f32 %v507_v63  ;;  %353 = vadd.xlane.f32.xlu0 %v352_v0 }
 0x25c   :  { %v672_v1 = vpop.f32.mrf.mxu3 }
 0x25d   :  { %v675_v2 = vmul.f32 0.35355338, %v672_v1 }
 0x25f   :  { %v1430_v3 = vpop.eup %1005  ;;  %v676_v4 = vmul.f32 1.442695, %v675_v2 }
 0x260   :  { %v509_v5 = vsel %vm248_vm1, %v1430_v3, 0.0 }
 0x261   :  { %1007 = vpow2.f32 %v676_v4  ;;  %510 = vadd.xlane.f32.xlu2 %v509_v5 }
 0x264   :  { %v829_v6 = vpop.f32.mrf.mxu3 }
 0x265   :  { %v832_v7 = vmul.f32 0.35355338, %v829_v6 }
 0x267   :  { %v1434_v8 = vpop.eup %1007  ;;  %v833_v9 = vmul.f32 1.442695, %v832_v7 }
 0x268   :  { %v678_v10 = vsel %vm248_vm1, %v1434_v8, 0.0 }
 0x269   :  { %1009 = vpow2.f32 %v833_v9  ;;  %679 = vadd.xlane.f32.xlu2 %v678_v10 }
 0x26d   :  { %698 = vrot.lane.b32.xlu0 %v1413_v15, %s1232_s26 }
 0x26f   :  { %v1440_v11 = vpop.eup %1009 }
 0x270   :  { %v835_v12 = vsel %vm248_vm1, %v1440_v11, 0.0 }
 0x271   :  { %836 = vadd.xlane.f32.xlu1 %v835_v12 }
 0x275   :  { %854 = vrot.lane.b32.xlu0 %v1413_v15, %s1231_s25 }
 0x281   :  { %776 = vrot.lane.b32.xlu2 %v1413_v15, %s1233_s6 }
 0x28a   :  { %528 = vrot.lane.b32.xlu1 %v1377_v43, %s1231_s25 }
 0x2b8   :  { %v473_v13 = vpop.f32.mrf.mxu2 }
 0x2b9   :  { %561 = vrot.lane.b32.xlu0 %v473_v13, %s1234_s8 }
 0x2cc   :  { %v354_v14 = vpop.xlane.xlu0 %353 }
 0x2cd   :  { %v355_v16 = vadd.f32 1e-08, %v354_v14 }
 0x2cf   :  { %1011 = vrcp.f32 %v355_v16  ;;  %v367_v23 = vand.u32 2147483648, %v355_v16  ;;  %v365_v15 = vand.u32 2147483647, %v355_v16  ;;  %vm361_vm5 = vweird.f32 %v355_v16 }
 0x2d1   :  { %v368_v29 = vor.u32 1.1754944e-38, %v367_v23  ;;  %vm366_vm7 = vcmp.eq.f32.partialorder %v365_v15, 8.507059e+37 }
 0x2d4   :  { %v511_v17 = vpop.xlane.xlu2 %510 }
 0x2d5   :  { %v1012_v18 = vpop.eup %1011  ;;  %v512_v19 = vadd.f32 1e-08, %v511_v17 }
 0x2d6   :  { %v357_v20 = vmul.f32 %v1012_v18, %v355_v16  ;;  %vm362_vm4 = vweird.f32 %v1012_v18 }
 0x2d7   :  { %1013 = vrcp.f32 %v512_v19  ;;  %vm363_vm6 = vmor %vm361_vm5, %vm362_vm4  ;;  %v524_v34 = vand.u32 2147483648, %v512_v19  ;;  %v522_v35 = vand.u32 2147483647, %v512_v19  ;;  %vm518_vm9 = vweird.f32 %v512_v19 }
 0x2d8   :  { %v358_v21 = vsub.f32 1.0, %v357_v20 }
 0x2d9   :  { %v525_v41 = vor.u32 1.1754944e-38, %v524_v34  ;;  %vm523_vm11 = vcmp.eq.f32.partialorder %v522_v35, 8.507059e+37 }
 0x2da   :  { %v359_v22 = vmul.f32 %v1012_v18, %v358_v21 }
 0x2dc   :  { %v680_v24 = vpop.xlane.xlu2 %679  ;;  %v360_v43 = vadd.f32 %v1012_v18, %v359_v22 }
 0x2dd   :  { %v1014_v25 = vpop.eup %1013  ;;  %v681_v26 = vadd.f32 1e-08, %v680_v24 }
 0x2de   :  { %v514_v27 = vmul.f32 %v1014_v25, %v512_v19  ;;  %v364_v28 = vsel %vm363_vm6, %v1012_v18, %v360_v43  ;;  %vm519_vm8 = vweird.f32 %v1014_v25  ;;  %vm569_vm6 = vcmask 130048  }
 0x2df   :  { %1015 = vrcp.f32 %v681_v26  ;;  %v369_v31 = vsel %vm366_vm7, %v368_v29, %v364_v28  ;;  %vm520_vm10 = vmor %vm518_vm9, %vm519_vm8  ;;  %v693_v47 = vand.u32 2147483648, %v681_v26  ;;  %v691_v50 = vand.u32 2147483647, %v681_v26  ;;  %v699_v63 = vpop.permute.xlu0 %698 }
 0x2e0   :  { %v515_v30 = vsub.f32 1.0, %v514_v27  ;;  %v370_v32 = vmul.f32 %v1004_v62, %v369_v31  ;;  %vm687_vm13 = vweird.f32 %v681_v26  ;;  %vm571_vm7 = vcmask 195584  }
 0x2e1   :  { %v694_v54 = vor.u32 1.1754944e-38, %v693_v47  ;;  %vm692_vm15 = vcmp.eq.f32.partialorder %v691_v50, 8.507059e+37 }
 0x2e2   :  { %v516_v33 = vmul.f32 %v1014_v25, %v515_v30  ;;  %950 = vmatmul.msk.f32.vlgmr.msrb.gmra.mxu0 %vm248_vm1, %v370_v32  ;;  %399 = vst.msk [vmem:[#allocation14 + $0x8] sm:$0xff] %vm248_vm1, %v370_v32 }
 0x2e4   :  { %v517_v36 = vadd.f32 %v1014_v25, %v516_v33  ;;  %v777_v37 = vpop.permute.xlu2 %776  ;;  %v837_v38 = vpop.xlane.xlu1 %836 }
 0x2e5   :  { %v1016_v39 = vpop.eup %1015  ;;  %v838_v40 = vadd.f32 1e-08, %v837_v38  ;;  %797 = vmatpush.msrb.mxu2 %v777_v37 }
 0x2e6   :  { %v683_v42 = vmul.f32 %v1016_v39, %v681_v26  ;;  %965 = vmatmul.msk.f32.vlgmr.msrb.gmra.mxu2 %vm248_vm1, %v1425_v56  ;;  %v521_v44 = vsel %vm520_vm10, %v1014_v25, %v517_v36  ;;  %vm688_vm12 = vweird.f32 %v1016_v39 }
 0x2e7   :  { %1017 = vrcp.f32 %v838_v40  ;;  %v526_v46 = vsel %vm523_vm11, %v525_v41, %v521_v44  ;;  %vm689_vm14 = vmor %vm687_vm13, %vm688_vm12  ;;  %v850_v60 = vand.u32 2147483648, %v838_v40  ;;  %v848_v62 = vand.u32 2147483647, %v838_v40  ;;  %v855_v6 = vpop.permute.xlu0 %854 }
 0x2e8   :  { %v684_v45 = vsub.f32 1.0, %v683_v42  ;;  %v527_v48 = vmul.f32 %v1430_v3, %v526_v46  ;;  %vm844_vm3 = vweird.f32 %v838_v40 }
 0x2e9   :  { %v851_v1 = vor.u32 1.1754944e-38, %v850_v60  ;;  %vm849_vm5 = vcmp.eq.f32.partialorder %v848_v62, 8.507059e+37 }
 0x2ea   :  { %v685_v49 = vmul.f32 %v1016_v39, %v684_v45  ;;  %555 = vst.msk [vmem:[#allocation14 + $0x18] sm:$0xff] %vm248_vm1, %v527_v48 }
 0x2ec   :  { %v686_v52 = vadd.f32 %v1016_v39, %v685_v49 }
 0x2ed   :  { %v1018_v53 = vpop.eup %1017 }
 0x2ee   :  { %v840_v55 = vmul.f32 %v1018_v53, %v838_v40  ;;  %v690_v56 = vsel %vm689_vm14, %v1016_v39, %v686_v52  ;;  %vm845_vm2 = vweird.f32 %v1018_v53 }
 0x2ef   :  { %v695_v57 = vsel %vm692_vm15, %v694_v54, %v690_v56  ;;  %vm846_vm4 = vmor %vm844_vm3, %vm845_vm2 }
 0x2f0   :  { %v841_v58 = vsub.f32 1.0, %v840_v55  ;;  %v696_v59 = vmul.f32 %v1434_v8, %v695_v57  ;;  %v642_v8 = vpop.f32.mrf.mxu2 }
 0x2f2   :  { %v842_v61 = vmul.f32 %v1018_v53, %v841_v58  ;;  %725 = vst.msk [vmem:[#allocation14 + $0x28] sm:$0xff] %vm248_vm1, %v696_v59 }
 0x2f4   :  { %v843_v0 = vadd.f32 %v1018_v53, %v842_v61 }
 0x2f6   :  { %v847_v2 = vsel %vm846_vm4, %v1018_v53, %v843_v0 }
 0x2f7   :  { %v852_v3 = vsel %vm849_vm5, %v851_v1, %v847_v2 }
 0x2f8   :  { %v853_v4 = vmul.f32 %v1440_v11, %v852_v3 }
 0x2fa   :  { %881 = vst.msk [vmem:[#allocation14 + $0x38] sm:$0xff] %vm248_vm1, %v853_v4 }
 0x2fb   :  { %924 = dma.vmem_to_hbm [thread:$0]  %s917_s28, 1024, %s919_s11, [#allocation15], %s1224_s21, %s1224_s21, %s1225_s22  }
 0x2fc   :  { %v529_v5 = vpop.permute.xlu1 %528 }
 0x2fd   :  { %549 = vmatpush.msra.mxu0 %v529_v5 }
 0x2fe   :  { %956 = vmatmul.msk.f32.vlgmr.msra.gmra.mxu0 %vm248_vm1, %v527_v48 }
 0x2ff   :  { %719 = vmatpush.msrb.mxu0 %v699_v63 }
 0x301   :  { %875 = vmatpush.msra.mxu0 %v855_v6 }
 0x306   :  { %962 = vmatmul.msk.f32.vlgmr.msrb.gmra.mxu0 %vm248_vm1, %v696_v59 }
 0x30e   :  { %968 = vmatmul.msk.f32.vlgmr.msra.gmra.mxu0 %vm248_vm1, %v853_v4 }
 0x32b   :  { %v562_v16 = vpop.permute.xlu0 %561 }
 0x35f   :  { %v395_v7 = vpop.f32.mrf.mxu0 }
 0x360   :  { %557 = vrot.lane.b32.xlu2 %v395_v7, %s1225_s22 }
 0x369   :  { %v799_v9 = vpop.f32.mrf.mxu2 }
 0x36a   :  { %887 = vrot.lane.b32.xlu0 %v799_v9, %s1234_s8 }
 0x37b   :  { %v551_v10 = vpop.f32.mrf.mxu0 }
 0x37c   :  { %565 = vrot.lane.b32.xlu1 %v551_v10, %s1235_s3 }
 0x383   :  { %v721_v11 = vpop.f32.mrf.mxu0 }
 0x384   :  { %883 = vrot.lane.b32.xlu2 %v721_v11, %s1225_s22 }
 0x38b   :  { %v877_v12 = vpop.f32.mrf.mxu0 }
 0x38c   :  { %891 = vrot.lane.b32.xlu1 %v877_v12, %s1235_s3 }
 0x3ba   :  { %v558_v13 = vpop.permute.xlu2 %557 }
 0x3bb   :  { %v568_v14 = vsel %vm248_vm1, %v1422_v51, %v558_v13 }
 0x3bc   :  { %v570_v18 = vsel %vm569_vm6, %v568_v14, %v562_v16 }
 0x3dc   :  { %v888_v22 = vpop.permute.xlu0 %887 }
 0x3de   :  { %v884_v20 = vpop.permute.xlu2 %883 }
 0x3df   :  { %v894_v21 = vsel %vm248_vm1, %v642_v8, %v884_v20 }
 0x3e0   :  { %v895_v23 = vsel %vm569_vm6, %v894_v21, %v888_v22 }
 0x3ee   :  { %v566_v17 = vpop.permute.xlu1 %565 }
 0x3ef   :  { %v572_v19 = vsel %vm571_vm7, %v570_v18, %v566_v17 }
 0x3f0   :  { %573 = vst.msk [vmem:[#allocation13] sm:$0xff] %vm144_vm0, %v572_v19 }
 0x3fe   :  { %v892_v51 = vpop.permute.xlu1 %891 }
 0x3ff   :  { %v896_v15 = vsel %vm571_vm7, %v895_v23, %v892_v51 }
 0x400   :  { %898 = vst.msk [vmem:[#allocation13 + $0x8] sm:$0xff] %vm144_vm0, %v896_v15 }
 0x401   :  { %911 = dma.vmem_to_hbm [thread:$0]  %s904_s0, 256, %s906_s14, [#allocation4], %s1224_s21, %s1224_s21, %s1225_s22  }
 0x402   :  { %1219 = dma.done.wait [#allocation4], 256  }
 0x403   :  { %1220 = vsyncadd [#allocation4], 4294967040 }
 0x404   :  { %1221 = dma.done.wait [#allocation15], 1024  }
 0x405   :  { %1222 = vsyncadd [#allocation15], 4294966272 }
 0x406   :  { %933 = vsyncpa [#allocation3], 1 }
 0x407   :  { %934 = vsyncpa [#allocation6], 1 }
 0x408   :  { %935 = vsyncpa [#allocation9], 1 }
 0x409   :  { %936 = vsyncpa [#allocation12], 1 }
 0x40a   :  { %937 = vsyncpa [#allocation4], 1 }
 0x40b   :  { %938 = vsyncpa [#allocation15], 1 }

</bundles_post_ra>
